<compile_context>
chip_gen: v7x
topology: tpu7x:2x2x1
jax: 0.10.0
libtpu: 0.0.40
codegen_flags: <defaults>
</compile_context>

<pallas_src>
import numpy as np
import jax
import jax.numpy as jnp
from jax import lax
from jax.experimental import pallas as pl
from jax.experimental.pallas import tpu as pltpu


def _round_up(v, m):
    return (v + m - 1) // m * m


def _vmem_limit(nbytes):
    # footprint + margin, floor 8 MiB, capped below the smallest physical VMEM
    # (v7x: 64 MiB/TC).  Raise toward ~100 MiB on v6e (128 MiB) if needed.
    return int(min(max(nbytes + (4 << 20), 8 << 20), 64 << 20))


# --------------------- kernel A: (pruned) lin + per-node ||h|| ---------------------
def _lin_kernel(x_ref, w_ref, h_ref, hnorm_ref):
    # FLOP-minor matmul kept near-f32 so the downstream threshold masks stay
    # bit-stable wrt the f32 reference; h stored bf16 for the aggregation kernel.
    h = lax.dot_general(x_ref[...], w_ref[...], (((1,), (1,)), ((), ())),
                        precision=lax.Precision.HIGHEST,
                        preferred_element_type=jnp.float32)        # [TN, Fo]
    h_ref[...] = h.astype(jnp.bfloat16)
    hnorm_ref[...] = jnp.sqrt(jnp.sum(h * h, axis=1, keepdims=True))   # [TN, 1]


# --------------- kernel B: prune-on-msg + gather + scatter-add + bias ---------------
def _agg_kernel(h_ref, b_ref, ew_ref, nmsg_ref, lock_ref, src_ref, dst_ref, thr_ref,
                out_ref, keep_ref):
    e = pl.program_id(0)
    n_pad = h_ref.shape[0]
    tile_m = src_ref.shape[1]

    @pl.when(e == 0)
    def _():   # resident accumulator init; bias is added to every node
        out_ref[...] = jnp.broadcast_to(b_ref[...], out_ref.shape)

    # prune_on_msg: keep locked edges (dst in node_lock or self-loop) or edges
    # whose message norm clears thr_a * mean(message norm).  All f32 on the VPU.
    keep = jnp.logical_or(lock_ref[...] != 0, nmsg_ref[...] >= thr_ref[...])   # [1,TM]
    keep_ref[...] = keep.astype(jnp.int32)                       # lane-dense store

    iota_n = lax.broadcasted_iota(jnp.int32, (n_pad, tile_m), 0)

    # weighted one-hot gather: msg[e, :] = keep*ew * h[src[e], :]   (MXU, bf16)
    keep_w = jnp.where(keep, ew_ref[...], 0.0).astype(jnp.bfloat16)       # [1, TM]
    s_mat = jnp.where(iota_n == src_ref[...], keep_w, 0.0)                # [Np,TM] bf16
    msg = lax.dot_general(s_mat, h_ref[...], (((0,), (0,)), ((), ())),
                          preferred_element_type=jnp.float32)             # [TM, Fo]

    # one-hot scatter-add over destination nodes                          (MXU, bf16)
    d_mat = (iota_n == dst_ref[...]).astype(jnp.bfloat16)                 # [Np, TM]
    out_ref[...] += lax.dot_general(d_mat, msg.astype(jnp.bfloat16),
                                    (((1,), (0,)), ((), ())),
                                    preferred_element_type=jnp.float32)


# ------------------------------------ wrapper ------------------------------------
def gcn_conv_thr_forward(x, W, bias, edge_index, edge_weight, node_lock,
                         thr_a=0.5, thr_w=0.5, *, edge_tile=256, node_tile=512):
    x = x.astype(jnp.float32)
    W = W.astype(jnp.float32)
    bias = bias.astype(jnp.float32)
    edge_weight = edge_weight.astype(jnp.float32)
    src = edge_index[0].astype(jnp.int32)
    dst = edge_index[1].astype(jnp.int32)

    n, f_in = x.shape
    f_out = W.shape[0]
    m = edge_weight.shape[0]

    # ---- ThrInPrune on lin.weight: tiny O(N*Fi + Fo*Fi) 1-D/elementwise XLA ----
    col_norm = jnp.sqrt(jnp.sum(x * x, axis=0))                     # per-in-feature
    norm_all = jnp.sqrt(jnp.sum(col_norm ** 2)) / f_in
    thr_wi = thr_w * norm_all / col_norm
    Wp = jnp.where((norm_all > 1e-8) & (jnp.abs(W) < thr_wi[None, :]), 0.0, W)

    # ---- padding: features -> x128 (lane-dense MXU tiles), nodes/edges tiled ----
    f_in_p = _round_up(f_in, 128)
    f_out_p = _round_up(f_out, 128)
    node_tile = _round_up(min(node_tile, _round_up(n, 8)), 8)
    n_p = _round_up(n, node_tile)
    m_p = _round_up(m, edge_tile)

    xp = jnp.zeros((n_p, f_in_p), jnp.float32).at[:n, :f_in].set(x)
    wpp = jnp.zeros((f_out_p, f_in_p), jnp.float32).at[:f_out, :f_in].set(Wp)
    bp = jnp.zeros((1, f_out_p), jnp.float32).at[0, :f_out].set(bias)

    # ---------------------------- kernel A: lin + hnorm ----------------------------
    num_n_tiles = n_p // node_tile
    vmem_a = 2 * (node_tile * f_in_p * 4 + f_out_p * f_in_p * 4
                  + node_tile * f_out_p * 2 + node_tile * 128 * 4)
    h, hnorm = pl.pallas_call(
        _lin_kernel,
        grid=(num_n_tiles,),
        in_specs=[pl.BlockSpec((node_tile, f_in_p), lambda i: (i, 0)),   # x tile
                  pl.BlockSpec((f_out_p, f_in_p), lambda i: (0, 0))],    # Wp (resident)
        out_specs=(pl.BlockSpec((node_tile, f_out_p), lambda i: (i, 0)),  # h (bf16)
                   pl.BlockSpec((node_tile, 1), lambda i: (i, 0))),       # ||h|| (f32)
        out_shape=(jax.ShapeDtypeStruct((n_p, f_out_p), jnp.bfloat16),
                   jax.ShapeDtypeStruct((n_p, 1), jnp.float32)),
        compiler_params=pltpu.CompilerParams(
            dimension_semantics=("parallel",),
            vmem_limit_bytes=_vmem_limit(vmem_a)),
    )(xp, wpp)

    # ---- per-edge bookkeeping (O(M) 1-D XLA: replaces the old pass-0 grid sweep) ----
    hnorm_n = hnorm[:, 0]                                   # padded node rows are 0
    norm_msg = jnp.abs(edge_weight) * hnorm_n[src]          # ||msg_e|| = |ew|*||h[src]||
    mean_norm = jnp.sum(norm_msg) / m
    thr_val = jnp.float32(thr_a) * mean_norm
    locked = (dst[:, None] == node_lock.astype(jnp.int32)[None, :]).any(axis=1) \
        | (src == dst)

    # lane-dense edge arrays; padded edges carry ew=0 / nmsg=0 / locked=0 -> no effect
    srcp = jnp.zeros((1, m_p), jnp.int32).at[0, :m].set(src)
    dstp = jnp.zeros((1, m_p), jnp.int32).at[0, :m].set(dst)
    ewp = jnp.zeros((1, m_p), jnp.float32).at[0, :m].set(edge_weight)
    nmsgp = jnp.zeros((1, m_p), jnp.float32).at[0, :m].set(norm_msg)
    lockp = jnp.zeros((1, m_p), jnp.int32).at[0, :m].set(locked.astype(jnp.int32))
    thr_arr = jnp.reshape(thr_val, (1, 1)).astype(jnp.float32)

    # -------------------------- kernel B: edge aggregation --------------------------
    num_e_tiles = m_p // edge_tile
    vmem_b = 2 * (n_p * f_out_p * (2 + 4)          # h (bf16) + out (f32), resident
                  + 8 * f_out_p * 4                # bias
                  + 6 * 8 * edge_tile * 4          # src/dst/ew/nmsg/lock + keep blocks
                  + 8 * 128 * 4)                   # thr scalar block
    out_p, keep_p = pl.pallas_call(
        _agg_kernel,
        grid=(num_e_tiles,),
        in_specs=[
            pl.BlockSpec((n_p, f_out_p), lambda e: (0, 0)),     # h (resident)
            pl.BlockSpec((1, f_out_p), lambda e: (0, 0)),       # bias
            pl.BlockSpec((1, edge_tile), lambda e: (0, e)),     # edge_weight
            pl.BlockSpec((1, edge_tile), lambda e: (0, e)),     # ||msg|| per edge
            pl.BlockSpec((1, edge_tile), lambda e: (0, e)),     # locked flag
            pl.BlockSpec((1, edge_tile), lambda e: (0, e)),     # src
            pl.BlockSpec((1, edge_tile), lambda e: (0, e)),     # dst
            pl.BlockSpec((1, 1), lambda e: (0, 0)),             # thr_a * mean_norm
        ],
        out_specs=(
            pl.BlockSpec((n_p, f_out_p), lambda e: (0, 0)),     # out (accumulator)
            pl.BlockSpec((1, edge_tile), lambda e: (0, e)),     # keep (lane-dense)
        ),
        out_shape=(jax.ShapeDtypeStruct((n_p, f_out_p), jnp.float32),
                   jax.ShapeDtypeStruct((1, m_p), jnp.int32)),
        compiler_params=pltpu.CompilerParams(
            dimension_semantics=("arbitrary",),
            vmem_limit_bytes=_vmem_limit(vmem_b)),
    )(h, bp, ewp, nmsgp, lockp, srcp, dstp, thr_arr)

    out = out_p[:n, :f_out]
    keep = keep_p[0, :m].astype(bool)
    return out, keep


# ------------------------------ pure-JAX reference ------------------------------
def reference(x, W, b, edge_index, edge_weight, node_lock, thr_a, thr_w):
    src, dst = edge_index[0], edge_index[1]
    col_norm = jnp.sqrt(jnp.sum(x * x, axis=0))
    norm_all = jnp.sqrt(jnp.sum(col_norm ** 2)) / x.shape[1]
    thr_wi = thr_w * norm_all / col_norm
    Wp = jnp.where((norm_all > 1e-8) & (jnp.abs(W) < thr_wi[None, :]), 0.0, W)
    h = jnp.dot(x, Wp.T, precision=lax.Precision.HIGHEST)
    msg = edge_weight[:, None] * h[src]
    norm_msg = jnp.sqrt(jnp.sum(msg * msg, axis=1))
    mean_norm = jnp.sum(norm_msg) / msg.shape[0]
    locked = (dst[:, None] == node_lock[None, :]).any(axis=1) | (src == dst)
    mask0 = (norm_msg < thr_a * mean_norm) & (~locked)
    msg = jnp.where(mask0[:, None], 0.0, msg)
    out = jnp.zeros((x.shape[0], W.shape[0]), jnp.float32).at[dst].add(msg) + b[None, :]
    return out, ~mask0, norm_msg, thr_a * mean_norm


if __name__ == "__main__":
    n, f_in, f_out, m = 64, 32, 32, 256
    thr_a, thr_w = 0.5, 0.5

    key = jax.random.PRNGKey(0)
    kx, kw, kb, ks, kd, ke = jax.random.split(key, 6)
    x = jax.random.normal(kx, (n, f_in), jnp.float32)
    limit = (6.0 / (f_in + f_out)) ** 0.5                        # glorot (pyg lin init)
    W = jax.random.uniform(kw, (f_out, f_in), jnp.float32, -limit, limit)
    bias = 0.1 * jax.random.normal(kb, (f_out,), jnp.float32)    # GCNConv bias param

    src = jax.random.randint(ks, (m,), 0, n, jnp.int32)
    dst = jax.random.randint(kd, (m,), 0, n, jnp.int32)
    dst = dst.at[:4].set(src[:4])                                # a few self-loop edges
    edge_index = jnp.stack([src, dst], axis=0)
    edge_weight = jax.random.uniform(ke, (m,), jnp.float32, minval=0.1, maxval=1.0)
    node_lock = jnp.array([0, 3], jnp.int32)

    out, keep = gcn_conv_thr_forward(x, W, bias, edge_index, edge_weight,
                                     node_lock, thr_a, thr_w,
                                     edge_tile=256, node_tile=64)
    jax.block_until_ready((out, keep))

    # host-side edge compaction (data-dependent output shape -> done outside kernel)
    keep_np = np.asarray(keep).reshape(-1).astype(bool)
    idx_keep = np.where(keep_np)[0]
    edge_index_pruned = np.asarray(edge_index)[:, idx_keep]
    edge_weight_pruned = np.asarray(edge_weight)[idx_keep]

    ref_out, ref_keep, ref_nmsg, ref_thr = reference(
        x, W, bias, edge_index, edge_weight, node_lock, thr_a, thr_w)

    # out: the FLOP-dominant gather/scatter matmuls deliberately run as 1-pass bf16
    # on the MXU (f32 accumulation) -> compare at bf16-level tolerance.
    assert np.allclose(np.asarray(out), np.asarray(ref_out), rtol=2e-2, atol=5e-2), \
        "output mismatch vs reference"

    # keep mask: decided in f32; allow flips only for edges numerically on the
    # threshold boundary (|ew|*||h[src]|| vs ||ew*h[src]|| rounding).
    ref_keep_np = np.asarray(ref_keep).astype(bool)
    if not np.array_equal(keep_np, ref_keep_np):
        flip = keep_np != ref_keep_np
        thr_f = float(ref_thr)
        rel = np.abs(np.asarray(ref_nmsg)[flip] - thr_f) / max(abs(thr_f), 1e-30)
        assert np.all(rel < 1e-5), "keep-mask mismatch beyond threshold boundary"
    assert edge_index_pruned.shape[1] == edge_weight_pruned.shape[0]

    print("KERNEL_OK")
</pallas_src>

<mosaic_0001>
module attributes {stable_mosaic.version = 11 : i64} {
  func.func @_lin_kernel(%arg0: i32, %arg1: memref<64x128xf32, #tpu.memory_space<vmem>>, %arg2: memref<128x128xf32, #tpu.memory_space<vmem>>, %arg3: memref<64x128xbf16, #tpu.memory_space<vmem>>, %arg4: memref<64x1xf32, #tpu.memory_space<vmem>>) attributes {dimension_semantics = [#tpu.dimension_semantics<parallel>], iteration_bounds = array<i64: 1>, scalar_prefetch = 0 : i64, scratch_operands = 0 : i64, tpu.core_type = #tpu.core_type<tc>, window_params = [{transform_indices = @transform_0, window_bounds = array<i64: 64, 128>}, {pipeline_mode = #tpu.pipeline_mode<synchronous>, transform_indices = @transform_1, window_bounds = array<i64: 128, 128>}, {transform_indices = @transform_2, window_bounds = array<i64: 64, 128>}, {transform_indices = @transform_3, window_bounds = array<i64: 64, 1>}]} {
    %c0 = arith.constant 0 : index
    %c0_0 = arith.constant 0 : index
    %0 = vector.load %arg1[%c0, %c0_0] : memref<64x128xf32, #tpu.memory_space<vmem>>, vector<64x128xf32>
    %c0_1 = arith.constant 0 : index
    %c0_2 = arith.constant 0 : index
    %1 = vector.load %arg2[%c0_1, %c0_2] : memref<128x128xf32, #tpu.memory_space<vmem>>, vector<128x128xf32>
    %cst = arith.constant dense<0.000000e+00> : vector<64x128xf32>
    %2 = tpu.matmul %0, %1, %cst {dimension_numbers = #tpu.dot_dimension_numbers<[1], [1], [0], [0], [0, 0, 1, 0], [], []>, precision = #tpu.contract_precision<fp32>} : vector<64x128xf32>, vector<128x128xf32>, vector<64x128xf32> -> vector<64x128xf32>
    %3 = arith.truncf %2 : vector<64x128xf32> to vector<64x128xbf16>
    %c0_3 = arith.constant 0 : index
    %c0_4 = arith.constant 0 : index
    %4 = vector.load %arg3[%c0_3, %c0_4] : memref<64x128xbf16, #tpu.memory_space<vmem>>, vector<64x128xbf16>
    tpu.vector_store %arg3[%c0_3, %c0_4], %3 {strides = array<i32>} : memref<64x128xbf16, #tpu.memory_space<vmem>>, vector<64x128xbf16>,
    %5 = arith.mulf %2, %2 : vector<64x128xf32>
    %cst_5 = arith.constant dense<0.000000e+00> : vector<64xf32>
    %6 = vector.multi_reduction <add>, %5, %cst_5 [1] : vector<64x128xf32> to vector<64xf32>
    %7 = vector.shape_cast %6 : vector<64xf32> to vector<64x1xf32>
    %8 = math.sqrt %7 : vector<64x1xf32>
    %c0_6 = arith.constant 0 : index
    %c0_7 = arith.constant 0 : index
    %9 = vector.load %arg4[%c0_6, %c0_7] : memref<64x1xf32, #tpu.memory_space<vmem>>, vector<64x1xf32>
    tpu.vector_store %arg4[%c0_6, %c0_7], %8 {strides = array<i32>} : memref<64x1xf32, #tpu.memory_space<vmem>>, vector<64x1xf32>,
    return
  }
  func.func @transform_0(%arg0: i32) -> (i32, i32) {
    %c0_i32 = arith.constant 0 : i32
    %c0_i32_0 = arith.constant 0 : i32
    return %arg0, %c0_i32 : i32, i32
  }
  func.func @transform_1(%arg0: i32) -> (i32, i32) {
    %c0_i32 = arith.constant 0 : i32
    %c0_i32_0 = arith.constant 0 : i32
    %c0_i32_1 = arith.constant 0 : i32
    return %c0_i32, %c0_i32_0 : i32, i32
  }
  func.func @transform_2(%arg0: i32) -> (i32, i32) {
    %c0_i32 = arith.constant 0 : i32
    %c0_i32_0 = arith.constant 0 : i32
    return %arg0, %c0_i32 : i32, i32
  }
  func.func @transform_3(%arg0: i32) -> (i32, i32) {
    %c0_i32 = arith.constant 0 : i32
    %c0_i32_0 = arith.constant 0 : i32
    return %arg0, %c0_i32 : i32, i32
  }
}

</mosaic_0001>

<bundles_post_ra>
// kernel: tpu_custom_call.1
= control target key start
LH: loop header
LB: loop body
LE: loop exit
PB: predicated region body
PF: predicated region fallthrough
CT: control target
= control target key end

     0   :  { %9 = vsyncpa [#allocation3], 0  ;;  %s2292_s0 = inlined_call_operand.hbm [shape: f32[64,128], index: 0, kind: input, shape index: {}]   ;;  %s2293_s1 = inlined_call_operand.hbm [shape: f32[128,128], index: 1, kind: input, shape index: {}]   ;;  %s2294_s2 = inlined_call_operand.hbm [shape: bf16[64,128], index: 2, kind: output, shape index: {0}]   ;;  %s2295_s3 = inlined_call_operand.vmem [shape: f32[64,1], index: 3, kind: output, shape index: {1}]  }
   0x1   :  { %10 = vsyncpa [#allocation6], 0 }
   0x2   :  { %11 = vsyncpa [#allocation4], 0  ;;  %s1933_s12 = smov [#allocation2]   ;;  %s1861_s16 = scalar_lea.hbm %s2292_s0, 1024 }
   0x3   :  { %s17_s13 = sshll.u32 %s1933_s12, 4  ;;  %p1862_p0 = scmp.ne.s32.totalorder %s2292_s0, %s1861_s16  ;;  %s18_s13 = int_to_ptr.vmem [resolvable:$true] %s17_s13 }
   0x4   :  { %p1865_p1 = scmp.lt.u32.totalorder %s1861_s16, %s2292_s0 }
   0x6   :  { %p1867_p2 = pnand %p1865_p1, %p1862_p0 }
   0x8   :  { %1870 = shalt.err (!%p1867_p2)
}
   0x9   :  { %s1871_s21 = scalar_lea.vmem %s18_s13, 1024  ;;  %p1876_p4 = scmp.lt.s32.totalorder %s18_s13, %s18_s13 }
   0xa   :  { %p1872_p3 = scmp.ne.s32.totalorder %s18_s13, %s1871_s21  ;;  %p1877_p5 = scmp.lt.s32.totalorder %s1871_s21, %s1871_s21 }
   0xc   :  { %p1878_p6 = por %p1877_p5, %p1876_p4 }
   0xe   :  { %p1879_p7 = pnand %p1878_p6, %p1872_p3 }
  0x10   :  { %1882 = shalt.err (!%p1879_p7)
}
  0x11   :  { %s1934_s22 = smov 128   ;;  %s1935_s23 = smov 8  }
  0x12   :  { %23 = dma.hbm_to_vmem [thread:$0]  %s2292_s0, 1024, %s18_s13, [#allocation3], %s1934_s22, %s1934_s22, %s1935_s23  }
  0x13   :  { %s1936_s26 = smov [#allocation5]   ;;  %s1883_s30 = scalar_lea.hbm %s2293_s1, 2048 }
  0x14   :  { %s29_s27 = sshll.u32 %s1936_s26, 4  ;;  %p1884_p8 = scmp.ne.s32.totalorder %s2293_s1, %s1883_s30  ;;  %s30_s27 = int_to_ptr.vmem [resolvable:$true] %s29_s27 }
  0x15   :  { %p1887_p9 = scmp.lt.u32.totalorder %s1883_s30, %s2293_s1 }
  0x17   :  { %p1889_p10 = pnand %p1887_p9, %p1884_p8 }
  0x19   :  { %1892 = shalt.err (!%p1889_p10)
}
  0x1a   :  { %s1893_s8 = scalar_lea.vmem %s30_s27, 2048  ;;  %p1898_p12 = scmp.lt.s32.totalorder %s30_s27, %s30_s27 }
  0x1b   :  { %p1894_p11 = scmp.ne.s32.totalorder %s30_s27, %s1893_s8  ;;  %p1899_p13 = scmp.lt.s32.totalorder %s1893_s8, %s1893_s8 }
  0x1d   :  { %p1900_p0 = por %p1899_p13, %p1898_p12 }
  0x1f   :  { %p1901_p1 = pnand %p1900_p0, %p1894_p11 }
  0x21   :  { %1904 = shalt.err (!%p1901_p1)
}
  0x22   :  { %35 = dma.hbm_to_vmem [thread:$0]  %s2293_s1, 2048, %s30_s27, [#allocation6], %s1934_s22, %s1934_s22, %s1935_s23  }
  0x23   :  { %1927 = dma.done.wait [#allocation3], 1024  }
  0x24   :  { %1928 = vsyncadd [#allocation3], 4294966272 }
  0x25   :  { %1929 = dma.done.wait [#allocation6], 2048  }
  0x26   :  { %1930 = vsyncadd [#allocation6], 4294965248  ;;  %v50_v0 = vld [vmem:[#allocation5] sm:$0xff]  ;;  %v51_v1 = vld [vmem:[#allocation5 + $0x8] sm:$0xff]  ;;  %s1937_s1 = smov [#allocation7]  }
  0x27   :  { %v52_v2 = vld [vmem:[#allocation5 + $0x10] sm:$0xff]  ;;  %v67_v3 = vand.u32 4294901760, %v50_v0  ;;  %v70_v4 = vand.u32 4294901760, %v51_v1  ;;  %v53_v5 = vld [vmem:[#allocation5 + $0x18] sm:$0xff]  ;;  %v54_v10 = vld [vmem:[#allocation5 + $0x20] sm:$0xff]  ;;  %s1142_s10 = sshll.u32 %s1937_s1, 4  ;;  %s1143_s10 = int_to_ptr.vmem [resolvable:$true] %s1142_s10 }
  0x28   :  { %v73_v6 = vand.u32 4294901760, %v52_v2  ;;  %v76_v7 = vand.u32 4294901760, %v53_v5  ;;  %v55_v11 = vld [vmem:[#allocation5 + $0x28] sm:$0xff]  ;;  %v42_v12 = vld [vmem:[#allocation2] sm:$0xff]  ;;  %v79_v14 = vand.u32 4294901760, %v54_v10  ;;  %v56_v19 = vld [vmem:[#allocation5 + $0x30] sm:$0xff]  ;;  %p1910_p3 = scmp.lt.s32.totalorder %s1143_s10, %s1143_s10 }
  0x29   :  { %v1984_v8 = vpack.c.bf16 %v70_v4, %v67_v3  ;;  %v1992_v13 = vand.u32 4294901760, %v42_v12  ;;  %v82_v15 = vand.u32 4294901760, %v55_v11  ;;  %v57_v20 = vld [vmem:[#allocation5 + $0x38] sm:$0xff]  ;;  %v85_v23 = vand.u32 4294901760, %v56_v19  ;;  %v58_v26 = vld [vmem:[#allocation5 + $0x40] sm:$0xff]  ;;  %v59_v27 = vld [vmem:[#allocation5 + $0x48] sm:$0xff] }
  0x2a   :  { %v1986_v9 = vpack.c.bf16 %v76_v7, %v73_v6  ;;  %v88_v24 = vand.u32 4294901760, %v57_v20  ;;  %v91_v28 = vand.u32 4294901760, %v58_v26  ;;  %v94_v29 = vand.u32 4294901760, %v59_v27  ;;  %v60_v31 = vld [vmem:[#allocation5 + $0x50] sm:$0xff]  ;;  %v61_v32 = vld [vmem:[#allocation5 + $0x58] sm:$0xff]  ;;  %v62_v49 = vld [vmem:[#allocation5 + $0x60] sm:$0xff] }
  0x2b   :  { %1607 = vmatprep.subr.bf16.mxu1 %v1984_v8  ;;  %1703 = vmatprep.subr.bf16.mxu0 %v1984_v8  ;;  %v1997_v16 = vsub.f32 %v42_v12, %v1992_v13  ;;  %v2000_v18 = vpack.c.bf16 %v82_v15, %v79_v14  ;;  %v97_v33 = vand.u32 4294901760, %v60_v31  ;;  %v100_v34 = vand.u32 4294901760, %v61_v32  ;;  %v63_v50 = vld [vmem:[#allocation5 + $0x68] sm:$0xff]  ;;  %v64_v59 = vld [vmem:[#allocation5 + $0x70] sm:$0xff]  ;;  %v65_v60 = vld [vmem:[#allocation5 + $0x78] sm:$0xff]  ;;  %s1905_s11 = scalar_lea.vmem %s1143_s10, 512 }
  0x2c   :  { %1609 = vmatpush3.bf16.xpose.msra.mxu1 %v1984_v8  ;;  %1705 = vmatpush3.bf16.xpose.msra.mxu0 %v1984_v8  ;;  %v2007_v25 = vpack.c.bf16 %v88_v24, %v85_v23  ;;  %v2013_v30 = vpack.c.bf16 %v94_v29, %v91_v28  ;;  %v2019_v35 = vsub.f32 %v50_v0, %v67_v3  ;;  %v103_v56 = vand.u32 4294901760, %v62_v49  ;;  %v43_v63 = vld [vmem:[#allocation2 + $0x8] sm:$0xff]  ;;  %p1906_p2 = scmp.ne.s32.totalorder %s1143_s10, %s1905_s11  ;;  %p1911_p4 = scmp.lt.s32.totalorder %s1905_s11, %s1905_s11 }
  0x2d   :  { %1611 = vmatprep.subr.bf16.mxu1 %v1986_v9  ;;  %1707 = vmatprep.subr.bf16.mxu0 %v1986_v9  ;;  %v149_v17 = vand.u32 4294901760, %v1997_v16  ;;  %v2021_v36 = vsub.f32 %v51_v1, %v70_v4  ;;  %v2023_v37 = vsub.f32 %v52_v2, %v73_v6  ;;  %v2025_v38 = vsub.f32 %v53_v5, %v76_v7  ;;  %v44_v6 = vld [vmem:[#allocation2 + $0x10] sm:$0xff]  ;;  %v45_v7 = vld [vmem:[#allocation2 + $0x18] sm:$0xff] }
  0x2e   :  { %v2027_v39 = vsub.f32 %v54_v10, %v79_v14  ;;  %v2029_v40 = vsub.f32 %v55_v11, %v82_v15  ;;  %v2031_v41 = vpack.c.bf16 %v100_v34, %v97_v33  ;;  %v2033_v42 = vsub.f32 %v56_v19, %v85_v23  ;;  %v46_v14 = vld [vmem:[#allocation2 + $0x20] sm:$0xff]  ;;  %v47_v23 = vld [vmem:[#allocation2 + $0x28] sm:$0xff]  ;;  %p1912_p5 = por %p1911_p4, %p1910_p3 }
  0x2f   :  { %v150_v21 = vsub.f32 %v1997_v16, %v149_v17  ;;  %1506 = vmatprep.mubr.f32.mxu0 %v149_v17  ;;  %v2035_v43 = vsub.f32 %v57_v20, %v88_v24  ;;  %v2037_v44 = vsub.f32 %v58_v26, %v91_v28  ;;  %v2039_v45 = vsub.f32 %v59_v27, %v94_v29 }
  0x30   :  { %v2043_v46 = vpack.c.bf16 %v2021_v36, %v2019_v35  ;;  %v2047_v47 = vpack.c.bf16 %v2025_v38, %v2023_v37  ;;  %v2051_v48 = vpack.c.bf16 %v2029_v40, %v2027_v39  ;;  %v2053_v51 = vsub.f32 %v60_v31, %v97_v33  ;;  %p1913_p6 = pnand %p1912_p5, %p1906_p2 }
  0x31   :  { %v151_v22 = vand.u32 4294901760, %v150_v21  ;;  %v2055_v52 = vsub.f32 %v61_v32, %v100_v34  ;;  %v2059_v53 = vpack.c.bf16 %v2035_v43, %v2033_v42  ;;  %v2063_v54 = vpack.c.bf16 %v2039_v45, %v2037_v44 }
  0x32   :  { %v106_v57 = vand.u32 4294901760, %v63_v50  ;;  %v2075_v61 = vsub.f32 %v62_v49, %v103_v56  ;;  %v109_v1 = vand.u32 4294901760, %v64_v59  ;;  %v112_v2 = vand.u32 4294901760, %v65_v60  ;;  %v49_v49 = vld [vmem:[#allocation2 + $0x38] sm:$0xff] }
  0x33   :  { %1374 = vmatprep.mubr.f32.mxu1 %v151_v22  ;;  %v2069_v55 = vpack.c.bf16 %v2055_v52, %v2053_v51  ;;  %v230_v3 = vand.u32 4294901760, %v2019_v35  ;;  %v237_v4 = vand.u32 4294901760, %v2021_v36  ;;  %v2089_v5 = vand.u32 4294901760, %v43_v63 }
  0x34   :  { %1613 = vmatpush3.bf16.xpose.msra.mxu1 %v1986_v9  ;;  %1709 = vmatpush3.bf16.xpose.msra.mxu0 %v1986_v9  ;;  %v2073_v58 = vpack.c.bf16 %v106_v57, %v103_v56  ;;  %v2077_v62 = vsub.f32 %v63_v50, %v106_v57  ;;  %v2091_v10 = vpack.c.bf16 %v112_v2, %v109_v1  ;;  %v2095_v15 = vand.u32 4294901760, %v44_v6 }
  0x35   :  { %1615 = vmatprep.subr.bf16.mxu1 %v2000_v18  ;;  %1711 = vmatprep.subr.bf16.mxu0 %v2000_v18  ;;  %v231_v11 = vsub.f32 %v2019_v35, %v230_v3  ;;  %v238_v12 = vsub.f32 %v2021_v36, %v237_v4  ;;  %v2097_v17 = vsub.f32 %v64_v59, %v109_v1  ;;  %v2104_v21 = vand.u32 4294901760, %v45_v7  ;;  %v48_v35 = vld [vmem:[#allocation2 + $0x30] sm:$0xff] }
  0x36   :  { %2305 = vst [vmem:[#allocation11_spill] sm:$0xff] %v2073_v58  ;;  %v2083_v0 = vpack.c.bf16 %v2077_v62, %v2075_v61  ;;  %2307 = vst [vmem:[#allocation13_spill] sm:$0xff] %v2091_v10  ;;  %v2099_v19 = vsub.f32 %v65_v60, %v112_v2  ;;  %v2102_v20 = vsub.f32 %v43_v63, %v2089_v5  ;;  %v2108_v22 = vand.u32 4294901760, %v46_v14 }
  0x37   :  { %v232_v26 = vand.u32 4294901760, %v231_v11  ;;  %v239_v27 = vand.u32 4294901760, %v238_v12  ;;  %v244_v28 = vand.u32 4294901760, %v2023_v37  ;;  %v251_v29 = vand.u32 4294901760, %v2025_v38 }
  0x38   :  { %2306 = vst [vmem:[#allocation12_spill] sm:$0xff] %v2083_v0  ;;  %2308 = vst [vmem:[#allocation14_spill] sm:$0xff] %v2102_v20  ;;  %v2112_v24 = vpack.c.bf16 %v2099_v19, %v2097_v17  ;;  %v2119_v31 = vsub.f32 %v44_v6, %v2095_v15  ;;  %v159_v32 = vand.u32 4294901760, %v2102_v20  ;;  %v2123_v33 = vsub.f32 %v45_v7, %v2104_v21 }
  0x39   :  { %v2125_v34 = vand.u32 4294901760, %v47_v23  ;;  %v2128_v36 = vsub.f32 %v46_v14, %v2108_v22  ;;  %v1638_v50 = vpack.c.bf16 %v239_v27, %v232_v26  ;;  %v1734_v56 = vpack.c.bf16 %v237_v4, %v230_v3 }
  0x3a   :  { %2309 = vst [vmem:[#allocation15_spill] sm:$0xff] %v2112_v24  ;;  %2310 = vst [vmem:[#allocation16_spill] sm:$0xff] %v2119_v31  ;;  %v245_v57 = vsub.f32 %v2023_v37, %v244_v28  ;;  %v252_v59 = vsub.f32 %v2025_v38, %v251_v29  ;;  %v169_v60 = vand.u32 4294901760, %v2119_v31  ;;  %v2133_v63 = vand.u32 4294901760, %v48_v35 }
  0x3b   :  { %2311 = vst [vmem:[#allocation17_spill] sm:$0xff] %v2123_v33  ;;  %v160_v1 = vsub.f32 %v2102_v20, %v159_v32  ;;  %v179_v2 = vand.u32 4294901760, %v2123_v33  ;;  %v2138_v6 = vsub.f32 %v47_v23, %v2125_v34  ;;  %v2140_v7 = vand.u32 4294901760, %v49_v49 }
  0x3c   :  { %1617 = vmatpush3.bf16.xpose.msra.mxu1 %v2000_v18  ;;  %1713 = vmatpush3.bf16.xpose.msra.mxu0 %v2000_v18  ;;  %v189_v37 = vand.u32 4294901760, %v2128_v36  ;;  %v246_v38 = vand.u32 4294901760, %v245_v57  ;;  %v253_v3 = vand.u32 4294901760, %v252_v59  ;;  %v258_v4 = vand.u32 4294901760, %v2027_v39 }
  0x3d   :  { %1619 = vmatprep.subr.bf16.mxu1 %v2007_v25  ;;  %1715 = vmatprep.subr.bf16.mxu0 %v2007_v25  ;;  %v265_v11 = vand.u32 4294901760, %v2029_v40  ;;  %v170_v12 = vsub.f32 %v2119_v31, %v169_v60  ;;  %v2149_v14 = vsub.f32 %v48_v35, %v2133_v63  ;;  %v161_v23 = vand.u32 4294901760, %v160_v1 }
  0x3e   :  { %v180_v26 = vsub.f32 %v2123_v33, %v179_v2  ;;  %v199_v27 = vand.u32 4294901760, %v2138_v6  ;;  %v2154_v20 = vsub.f32 %v49_v49, %v2140_v7  ;;  %v190_v57 = vsub.f32 %v2128_v36, %v189_v37 }
  0x3f   :  { %v1642_v59 = vpack.c.bf16 %v253_v3, %v246_v38  ;;  %v259_v24 = vsub.f32 %v2027_v39, %v258_v4  ;;  %v171_v31 = vand.u32 4294901760, %v170_v12  ;;  %v209_v35 = vand.u32 4294901760, %v2149_v14 }
  0x40   :  { %v181_v1 = vand.u32 4294901760, %v180_v26  ;;  %v200_v33 = vsub.f32 %v2138_v6, %v199_v27  ;;  %v219_v0 = vand.u32 4294901760, %v2154_v20  ;;  %v191_v49 = vand.u32 4294901760, %v190_v57 }
  0x41   :  { %v272_v39 = vand.u32 4294901760, %v2033_v42  ;;  %v300_v26 = vand.u32 4294901760, %v2053_v51 }
  0x42   :  { %v201_v38 = vand.u32 4294901760, %v200_v33  ;;  %v220_v3 = vsub.f32 %v2154_v20, %v219_v0 }
  0x44   :  { %1621 = vmatpush3.bf16.xpose.msra.mxu1 %v2007_v25  ;;  %1717 = vmatpush3.bf16.xpose.msra.mxu0 %v2007_v25 }
  0x45   :  { %1623 = vmatprep.subr.bf16.mxu1 %v2013_v30  ;;  %1719 = vmatprep.subr.bf16.mxu0 %v2013_v30 }
  0x4c   :  { %1625 = vmatpush3.bf16.xpose.msra.mxu1 %v2013_v30  ;;  %1721 = vmatpush3.bf16.xpose.msra.mxu0 %v2013_v30 }
  0x4d   :  { %1627 = vmatprep.subr.bf16.mxu1 %v2031_v41  ;;  %1723 = vmatprep.subr.bf16.mxu0 %v2031_v41 }
  0x54   :  { %1629 = vmatpush3.bf16.xpose.msra.mxu1 %v2031_v41  ;;  %1725 = vmatpush3.bf16.xpose.msra.mxu0 %v2031_v41 }
  0x55   :  { %1631 = vmatprep.subr.bf16.mxu1 %v2073_v58  ;;  %1727 = vmatprep.subr.bf16.mxu0 %v2073_v58 }
  0x5c   :  { %1633 = vmatpush3.bf16.xpose.msra.mxu1 %v2073_v58  ;;  %1729 = vmatpush3.bf16.xpose.msra.mxu0 %v2073_v58  ;;  %v266_v58 = vsub.f32 %v2029_v40, %v265_v11  ;;  %v279_v40 = vand.u32 4294901760, %v2035_v43 }
  0x5d   :  { %1635 = vmatprep.subr.bf16.mxu1 %v2091_v10  ;;  %1731 = vmatprep.subr.bf16.mxu0 %v2091_v10 }
  0x64   :  { %1637 = vmatpush3.bf16.xpose.msra.mxu1 %v2091_v10  ;;  %1733 = vmatpush3.bf16.xpose.msra.mxu0 %v2091_v10  ;;  %v1738_v10 = vpack.c.bf16 %v251_v29, %v244_v28  ;;  %v260_v28 = vand.u32 4294901760, %v259_v24  ;;  %v267_v29 = vand.u32 4294901760, %v266_v58  ;;  %v273_v24 = vsub.f32 %v2033_v42, %v272_v39 }
  0x65   :  { %1639 = vmatprep.subr.bf16.mxu1 %v1638_v50  ;;  %1735 = vmatprep.subr.bf16.mxu0 %v1734_v56  ;;  %v280_v58 = vsub.f32 %v2035_v43, %v279_v40  ;;  %v1746_v43 = vpack.c.bf16 %v279_v40, %v272_v39 }
  0x67   :  { %v281_v33 = vand.u32 4294901760, %v280_v58 }
  0x6b   :  { %1375 = vmatmul.mubr.f32.vlgmr.msra.gmra.mrb[0].mxu1 %v161_v23  ;;  %1507 = vmatmul.mubr.f32.vlgmr.msra.gmra.mrb[0].mxu0 %v159_v32  ;;  %v210_v32 = vsub.f32 %v2149_v14, %v209_v35 }
  0x6c   :  { %1641 = vmatpush3.bf16.xpose.msra.mxu1 %v1638_v50  ;;  %1737 = vmatpush3.bf16.xpose.msra.mxu0 %v1734_v56  ;;  %v1646_v50 = vpack.c.bf16 %v267_v29, %v260_v28  ;;  %v1742_v56 = vpack.c.bf16 %v265_v11, %v258_v4 }
  0x6d   :  { %1643 = vmatprep.subr.bf16.mxu1 %v1642_v59  ;;  %1739 = vmatprep.subr.bf16.mxu0 %v1738_v10  ;;  %v211_v12 = vand.u32 4294901760, %v210_v32  ;;  %v328_v32 = vand.u32 4294901760, %v2097_v17 }
  0x6e   :  { %1377 = vmatprep.mubr.f32.mxu1 %v171_v31  ;;  %1509 = vmatprep.mubr.f32.mxu0 %v169_v60  ;;  %v221_v31 = vand.u32 4294901760, %v220_v3  ;;  %v274_v60 = vand.u32 4294901760, %v273_v24 }
  0x6f   :  { %1378 = vmatmul.mubr.f32.gmra.mrb[2].mxu1 %v181_v1  ;;  %1510 = vmatmul.mubr.f32.gmra.mrb[2].mxu0 %v179_v2  ;;  %v286_v2 = vand.u32 4294901760, %v2037_v44  ;;  %v314_v1 = vand.u32 4294901760, %v2075_v61 }
  0x70   :  { %1380 = vmatprep.mubr.f32.mxu1 %v191_v49  ;;  %1512 = vmatprep.mubr.f32.mxu0 %v189_v37  ;;  %v293_v37 = vand.u32 4294901760, %v2039_v45  ;;  %v1650_v42 = vpack.c.bf16 %v281_v33, %v274_v60  ;;  %v321_v49 = vand.u32 4294901760, %v2077_v62 }
  0x71   :  { %v315_v39 = vsub.f32 %v2075_v61, %v314_v1 }
  0x72   :  { %v294_v4 = vsub.f32 %v2039_v45, %v293_v37  ;;  %v1750_v57 = vpack.c.bf16 %v293_v37, %v286_v2  ;;  %v322_v40 = vsub.f32 %v2077_v62, %v321_v49 }
  0x73   :  { %1381 = vmatmul.mubr.f32.gmra.mrb[4].mxu1 %v201_v38  ;;  %1513 = vmatmul.mubr.f32.gmra.mrb[4].mxu0 %v199_v27  ;;  %v335_v38 = vand.u32 4294901760, %v2099_v19 }
  0x74   :  { %1645 = vmatpush3.bf16.xpose.msra.mxu1 %v1642_v59  ;;  %1741 = vmatpush3.bf16.xpose.msra.mxu0 %v1738_v10  ;;  %v287_v10 = vsub.f32 %v2037_v44, %v286_v2  ;;  %v295_v23 = vand.u32 4294901760, %v294_v4  ;;  %v301_v59 = vsub.f32 %v2053_v51, %v300_v26  ;;  %v316_v51 = vand.u32 4294901760, %v315_v39 }
  0x75   :  { %1647 = vmatprep.subr.bf16.mxu1 %v1646_v50  ;;  %1743 = vmatprep.subr.bf16.mxu0 %v1742_v56  ;;  %v336_v24 = vsub.f32 %v2099_v19, %v335_v38 }
  0x76   :  { %1383 = vmatprep.mubr.f32.mxu1 %v211_v12  ;;  %1515 = vmatprep.mubr.f32.mxu0 %v209_v35  ;;  %v288_v11 = vand.u32 4294901760, %v287_v10  ;;  %v302_v44 = vand.u32 4294901760, %v301_v59  ;;  %v1762_v12 = vpack.c.bf16 %v335_v38, %v328_v32 }
  0x77   :  { %1384 = vmatmul.mubr.f32.gmra.mrb[6].mxu1 %v221_v31  ;;  %1516 = vmatmul.mubr.f32.gmra.mrb[6].mxu0 %v219_v0  ;;  %v307_v0 = vand.u32 4294901760, %v2055_v52  ;;  %v337_v62 = vand.u32 4294901760, %v336_v24 }
  0x78   :  { %1418 = vmatprep.mubr.f32.mxu1 %v1992_v13  ;;  %1550 = vmatprep.mubr.f32.mxu0 %v1992_v13  ;;  %v1654_v27 = vpack.c.bf16 %v295_v23, %v288_v11 }
  0x79   :  { %v308_v35 = vsub.f32 %v2055_v52, %v307_v0  ;;  %v1754_v29 = vpack.c.bf16 %v307_v0, %v300_v26  ;;  %v323_v52 = vand.u32 4294901760, %v322_v40 }
  0x7b   :  { %v309_v45 = vand.u32 4294901760, %v308_v35  ;;  %v1662_v3 = vpack.c.bf16 %v323_v52, %v316_v51 }
  0x7c   :  { %1649 = vmatpush3.bf16.xpose.msra.mxu1 %v1646_v50  ;;  %1745 = vmatpush3.bf16.xpose.msra.mxu0 %v1742_v56  ;;  %v1758_v50 = vpack.c.bf16 %v321_v49, %v314_v1  ;;  %v329_v56 = vsub.f32 %v2097_v17, %v328_v32 }
  0x7d   :  { %1651 = vmatprep.subr.bf16.mxu1 %v1650_v42  ;;  %1747 = vmatprep.subr.bf16.mxu0 %v1746_v43  ;;  %v1658_v28 = vpack.c.bf16 %v309_v45, %v302_v44 }
  0x7e   :  { %v330_v61 = vand.u32 4294901760, %v329_v56 }
  0x80   :  { %v1666_v58 = vpack.c.bf16 %v337_v62, %v330_v61 }
  0x84   :  { %1653 = vmatpush3.bf16.xpose.msra.mxu1 %v1650_v42  ;;  %1749 = vmatpush3.bf16.xpose.msra.mxu0 %v1746_v43 }
  0x85   :  { %1655 = vmatprep.subr.bf16.mxu1 %v1654_v27  ;;  %1751 = vmatprep.subr.bf16.mxu0 %v1750_v57 }
  0x8c   :  { %1657 = vmatpush3.bf16.xpose.msra.mxu1 %v1654_v27  ;;  %1753 = vmatpush3.bf16.xpose.msra.mxu0 %v1750_v57 }
  0x8d   :  { %1659 = vmatprep.subr.bf16.mxu1 %v1658_v28  ;;  %1755 = vmatprep.subr.bf16.mxu0 %v1754_v29 }
  0x94   :  { %1661 = vmatpush3.bf16.xpose.msra.mxu1 %v1658_v28  ;;  %1757 = vmatpush3.bf16.xpose.msra.mxu0 %v1754_v29 }
  0x95   :  { %1663 = vmatprep.subr.bf16.mxu1 %v1662_v3  ;;  %1759 = vmatprep.subr.bf16.mxu0 %v1758_v50 }
  0x9c   :  { %1665 = vmatpush3.bf16.xpose.msra.mxu1 %v1662_v3  ;;  %1761 = vmatpush3.bf16.xpose.msra.mxu0 %v1758_v50 }
  0x9d   :  { %1667 = vmatprep.subr.bf16.mxu1 %v1666_v58  ;;  %1763 = vmatprep.subr.bf16.mxu0 %v1762_v12 }
  0xa4   :  { %1669 = vmatpush3.bf16.xpose.msra.mxu1 %v1666_v58  ;;  %1765 = vmatpush3.bf16.xpose.msra.mxu0 %v1762_v12 }
  0xa5   :  { %1671 = vmatprep.subr.bf16.mxu1 %v2043_v46  ;;  %1767 = vmatprep.subr.bf16.mxu0 %v1984_v8 }
  0xab   :  { %1419 = vmatmul.mubr.f32.vlgmr.msra.gmra.mrb[0].mxu1 %v2089_v5  ;;  %1551 = vmatmul.mubr.f32.vlgmr.msra.gmra.mrb[0].mxu0 %v2089_v5 }
  0xac   :  { %1673 = vmatpush3.bf16.xpose.msra.mxu1 %v2043_v46  ;;  %1769 = vmatpush3.bf16.xpose.msra.mxu0 %v1984_v8  ;;  %v2312_v8 = vld [vmem:[#allocation12_spill] sm:$0xff] }
  0xad   :  { %1675 = vmatprep.subr.bf16.mxu1 %v2047_v47  ;;  %1771 = vmatprep.subr.bf16.mxu0 %v1986_v9 }
  0xae   :  { %1421 = vmatprep.mubr.f32.mxu1 %v2095_v15  ;;  %1553 = vmatprep.mubr.f32.mxu0 %v2095_v15 }
  0xaf   :  { %1422 = vmatmul.mubr.f32.gmra.mrb[2].mxu1 %v2104_v21  ;;  %1554 = vmatmul.mubr.f32.gmra.mrb[2].mxu0 %v2104_v21 }
  0xb0   :  { %1424 = vmatprep.mubr.f32.mxu1 %v2108_v22  ;;  %1556 = vmatprep.mubr.f32.mxu0 %v2108_v22 }
  0xb3   :  { %1425 = vmatmul.mubr.f32.gmra.mrb[4].mxu1 %v2125_v34  ;;  %1557 = vmatmul.mubr.f32.gmra.mrb[4].mxu0 %v2125_v34 }
  0xb4   :  { %1677 = vmatpush3.bf16.xpose.msra.mxu1 %v2047_v47  ;;  %1773 = vmatpush3.bf16.xpose.msra.mxu0 %v1986_v9  ;;  %v2313_v9 = vld [vmem:[#allocation11_spill] sm:$0xff] }
  0xb5   :  { %1679 = vmatprep.subr.bf16.mxu1 %v2051_v48  ;;  %1775 = vmatprep.subr.bf16.mxu0 %v2000_v18 }
  0xb6   :  { %1427 = vmatprep.mubr.f32.mxu1 %v2133_v63  ;;  %1559 = vmatprep.mubr.f32.mxu0 %v2133_v63 }
  0xb7   :  { %1428 = vmatmul.mubr.f32.gmra.mrb[6].mxu1 %v2140_v7  ;;  %1560 = vmatmul.mubr.f32.gmra.mrb[6].mxu0 %v2140_v7 }
  0xb8   :  { %1462 = vmatprep.mubr.f32.mxu1 %v1997_v16  ;;  %1594 = vmatprep.mubr.f32.mxu0 %v1992_v13  ;;  %v2314_v13 = vld [vmem:[#allocation15_spill] sm:$0xff]  ;;  %v2315_v16 = vld [vmem:[#allocation13_spill] sm:$0xff] }
  0xbc   :  { %1681 = vmatpush3.bf16.xpose.msra.mxu1 %v2051_v48  ;;  %1777 = vmatpush3.bf16.xpose.msra.mxu0 %v2000_v18  ;;  %v2316_v18 = vld [vmem:[#allocation14_spill] sm:$0xff] }
  0xbd   :  { %1683 = vmatprep.subr.bf16.mxu1 %v2059_v53  ;;  %1779 = vmatprep.subr.bf16.mxu0 %v2007_v25 }
  0xc4   :  { %1685 = vmatpush3.bf16.xpose.msra.mxu1 %v2059_v53  ;;  %1781 = vmatpush3.bf16.xpose.msra.mxu0 %v2007_v25  ;;  %v2317_v25 = vld [vmem:[#allocation16_spill] sm:$0xff] }
  0xc5   :  { %1687 = vmatprep.subr.bf16.mxu1 %v2063_v54  ;;  %1783 = vmatprep.subr.bf16.mxu0 %v2013_v30 }
  0xcc   :  { %1689 = vmatpush3.bf16.xpose.msra.mxu1 %v2063_v54  ;;  %1785 = vmatpush3.bf16.xpose.msra.mxu0 %v2013_v30  ;;  %v2318_v30 = vld [vmem:[#allocation17_spill] sm:$0xff] }
  0xcd   :  { %1691 = vmatprep.subr.bf16.mxu1 %v2069_v55  ;;  %1787 = vmatprep.subr.bf16.mxu0 %v2031_v41 }
  0xd4   :  { %1693 = vmatpush3.bf16.xpose.msra.mxu1 %v2069_v55  ;;  %1789 = vmatpush3.bf16.xpose.msra.mxu0 %v2031_v41 }
  0xd5   :  { %1695 = vmatprep.subr.bf16.mxu1 %v2312_v8  ;;  %1791 = vmatprep.subr.bf16.mxu0 %v2313_v9 }
  0xdc   :  { %1697 = vmatpush3.bf16.xpose.msra.mxu1 %v2312_v8  ;;  %1793 = vmatpush3.bf16.xpose.msra.mxu0 %v2313_v9 }
  0xdd   :  { %1699 = vmatprep.subr.bf16.mxu1 %v2314_v13  ;;  %1795 = vmatprep.subr.bf16.mxu0 %v2315_v16 }
  0xe4   :  { %1701 = vmatpush3.bf16.xpose.msra.mxu1 %v2314_v13  ;;  %1797 = vmatpush3.bf16.xpose.msra.mxu0 %v2315_v16 }
  0xeb   :  { %1463 = vmatmul.mubr.f32.vlgmr.msra.gmra.mrb[0].mxu1 %v2316_v18  ;;  %1595 = vmatmul.mubr.f32.vlgmr.msra.gmra.mrb[0].mxu0 %v2089_v5 }
  0xec   :  { %1465 = vmatprep.mubr.f32.mxu1 %v2317_v25  ;;  %1597 = vmatprep.mubr.f32.mxu0 %v2095_v15 }
  0xef   :  { %1466 = vmatmul.mubr.f32.gmra.mrb[2].mxu1 %v2318_v30  ;;  %1598 = vmatmul.mubr.f32.gmra.mrb[2].mxu0 %v2104_v21 }
  0xf0   :  { %1468 = vmatprep.mubr.f32.mxu1 %v2128_v36  ;;  %1600 = vmatprep.mubr.f32.mxu0 %v2108_v22 }
  0xf3   :  { %1469 = vmatmul.mubr.f32.gmra.mrb[4].mxu1 %v2138_v6  ;;  %1601 = vmatmul.mubr.f32.gmra.mrb[4].mxu0 %v2125_v34 }
  0xf4   :  { %1471 = vmatprep.mubr.f32.mxu1 %v2149_v14  ;;  %1603 = vmatprep.mubr.f32.mxu0 %v2133_v63 }
  0xf7   :  { %1472 = vmatmul.mubr.f32.gmra.mrb[6].mxu1 %v2154_v20  ;;  %1604 = vmatmul.mubr.f32.gmra.mrb[6].mxu0 %v2140_v7 }
 0x1be   :  { %v1464_v41 = vpop.f32.mrb[0].mxu1  ;;  %v1596_v46 = vpop.f32.mrb[0].mxu0 }
 0x1bf   :  { %v1798_v47 = vadd.f32 %v1596_v46, %v1464_v41  ;;  %v520_v48 = vpop.f32.mrb[1].mxu1  ;;  %v962_v53 = vpop.f32.mrb[1].mxu0 }
 0x1c0   :  { %v1799_v54 = vadd.f32 %v962_v53, %v520_v48 }
 0x1c1   :  { %v1049_v55 = vmul.f32 %v1798_v47, %v1798_v47 }
 0x1c2   :  { %v1178_v5 = vpack.c.bf16 %v1798_v47, %v1799_v54  ;;  %v1467_v15 = vpop.f32.mrb[2].mxu1  ;;  %v1599_v17 = vpop.f32.mrb[2].mxu0  ;;  %v1048_v36 = vmul.f32 %v1799_v54, %v1799_v54 }
 0x1c3   :  { %v1800_v19 = vadd.f32 %v1599_v17, %v1467_v15  ;;  %v974_v21 = vpop.f32.mrb[3].mxu0  ;;  %1058 = vadd.xlane.f32.xlu0 %v1049_v55  ;;  %v534_v22 = vpop.f32.mrb[3].mxu1 }
 0x1c4   :  { %1179 = vst [vmem:[#allocation7] sm:$0xff] %v1178_v5   ;;  %v1801_v34 = vadd.f32 %v974_v21, %v534_v22 }
 0x1c5   :  { %v1051_v20 = vmul.f32 %v1800_v19, %v1800_v19 }
 0x1c6   :  { %v1183_v63 = vpack.c.bf16 %v1800_v19, %v1801_v34  ;;  %v1470_v6 = vpop.f32.mrb[4].mxu1  ;;  %v1602_v7 = vpop.f32.mrb[4].mxu0  ;;  %v1050_v2 = vmul.f32 %v1801_v34, %v1801_v34 }
 0x1c7   :  { %v1802_v14 = vadd.f32 %v1602_v7, %v1470_v6  ;;  %v986_v31 = vpop.f32.mrb[5].mxu0  ;;  %1056 = vadd.xlane.f32.xlu0 %v1048_v36  ;;  %1062 = vadd.xlane.f32.xlu1 %v1051_v20  ;;  %v548_v60 = vpop.f32.mrb[5].mxu1 }
 0x1c8   :  { %1195 = vst [vmem:[#allocation7 + $0x8] sm:$0xff] %v1183_v63   ;;  %v1803_v33 = vadd.f32 %v986_v31, %v548_v60 }
 0x1c9   :  { %v1053_v0 = vmul.f32 %v1802_v14, %v1802_v14 }
 0x1ca   :  { %v1188_v37 = vpack.c.bf16 %v1802_v14, %v1803_v33  ;;  %v1473_v42 = vpop.f32.mrb[6].mxu1  ;;  %v1605_v43 = vpop.f32.mrb[6].mxu0  ;;  %v1052_v10 = vmul.f32 %v1803_v33, %v1803_v33 }
 0x1cb   :  { %v1804_v4 = vadd.f32 %v1605_v43, %v1473_v42  ;;  %v998_v11 = vpop.f32.mrb[7].mxu0  ;;  %1060 = vadd.xlane.f32.xlu1 %v1050_v2  ;;  %v562_v23 = vpop.f32.mrb[7].mxu1 }
 0x1cc   :  { %1196 = vst [vmem:[#allocation7 + $0x10] sm:$0xff] %v1188_v37   ;;  %v1805_v26 = vadd.f32 %v998_v11, %v562_v23  ;;  %1064 = vadd.xlane.f32.xlu0 %v1052_v10 }
 0x1cd   :  { %v1055_v59 = vmul.f32 %v1804_v4, %v1804_v4 }
 0x1ce   :  { %v1193_v27 = vpack.c.bf16 %v1804_v4, %v1805_v26  ;;  %v1054_v57 = vmul.f32 %v1805_v26, %v1805_v26 }
 0x1cf   :  { %1066 = vadd.xlane.f32.xlu1 %v1053_v0 }
 0x1d0   :  { %1197 = vst [vmem:[#allocation7 + $0x18] sm:$0xff] %v1193_v27   ;;  %1068 = vadd.xlane.f32.xlu0 %v1054_v57 }
 0x1d3   :  { %1070 = vadd.xlane.f32.xlu1 %v1055_v59 }
 0x1d4   :  { %1916 = shalt.err (!%p1913_p6)
}
 0x1d5   :  { %s1917_s14 = scalar_lea.hbm %s2294_s2, 512 }
 0x1d6   :  { %p1918_p7 = scmp.ne.s32.totalorder %s2294_s2, %s1917_s14  ;;  %p1921_p8 = scmp.lt.u32.totalorder %s1917_s14, %s2294_s2 }
 0x1d8   :  { %p1923_p9 = pnand %p1921_p8, %p1918_p7 }
 0x1da   :  { %1926 = shalt.err (!%p1923_p9)
}
 0x1db   :  { %s1938_s19 = smov 64   ;;  %s1939_s20 = smov 4   ;;  %vm1128_vm0 = vcmask 7168  }
 0x1dc   :  { %1148 = dma.vmem_to_hbm [thread:$0]  %s1143_s10, 512, %s2294_s2, [#allocation4], %s1938_s19, %s1938_s19, %s1939_s20  }
 0x250   :  { %v1059_v35 = vpop.xlane.xlu0 %1058 }
 0x251   :  { %1845 = vrsqrt.f32 %v1059_v35  ;;  %vm1081_vm1 = vcmp.eq.f32.partialorder %v1059_v35, inf  ;;  %v1084_v40 = vand.u32 2147483648, %v1059_v35  ;;  %vm1083_vm2 = vcmp.eq.f32.partialorder %v1059_v35, 0.0 }
 0x254   :  { %v1057_v44 = vpop.xlane.xlu0 %1056  ;;  %v1063_v45 = vpop.xlane.xlu1 %1062 }
 0x255   :  { %1847 = vrsqrt.f32 %v1057_v44  ;;  %vm1074_vm3 = vcmp.eq.f32.partialorder %v1057_v44, inf  ;;  %v1077_v24 = vand.u32 2147483648, %v1057_v44  ;;  %vm1076_vm4 = vcmp.eq.f32.partialorder %v1057_v44, 0.0 }
 0x256   :  { %1849 = vrsqrt.f32 %v1063_v45  ;;  %vm1095_vm5 = vcmp.eq.f32.partialorder %v1063_v45, inf  ;;  %v1098_v58 = vand.u32 2147483648, %v1063_v45  ;;  %vm1097_vm6 = vcmp.eq.f32.partialorder %v1063_v45, 0.0 }
 0x258   :  { %v1061_v1 = vpop.xlane.xlu1 %1060 }
 0x259   :  { %1851 = vrsqrt.f32 %v1061_v1  ;;  %v1065_v49 = vpop.xlane.xlu0 %1064  ;;  %vm1088_vm7 = vcmp.eq.f32.partialorder %v1061_v1, inf  ;;  %v1091_v25 = vand.u32 2147483648, %v1061_v1  ;;  %vm1090_vm8 = vcmp.eq.f32.partialorder %v1061_v1, 0.0 }
 0x25a   :  { %1853 = vrsqrt.f32 %v1065_v49  ;;  %vm1102_vm9 = vcmp.eq.f32.partialorder %v1065_v49, inf  ;;  %v1105_v46 = vand.u32 2147483648, %v1065_v49  ;;  %vm1104_vm10 = vcmp.eq.f32.partialorder %v1065_v49, 0.0 }
 0x25b   :  { %v1846_v28 = vpop.eup %1845 }
 0x25c   :  { %v1080_v29 = vmul.f32 %v1846_v28, %v1059_v35  ;;  %v1067_v39 = vpop.xlane.xlu1 %1066 }
 0x25d   :  { %1855 = vrsqrt.f32 %v1067_v39  ;;  %v1069_v51 = vpop.xlane.xlu0 %1068  ;;  %vm1109_vm11 = vcmp.eq.f32.partialorder %v1067_v39, inf  ;;  %v1112_v15 = vand.u32 2147483648, %v1067_v39  ;;  %vm1111_vm12 = vcmp.eq.f32.partialorder %v1067_v39, 0.0 }
 0x25e   :  { %v1082_v52 = vsel %vm1081_vm1, %v1059_v35, %v1080_v29  ;;  %1857 = vrsqrt.f32 %v1069_v51  ;;  %vm1116_vm13 = vcmp.eq.f32.partialorder %v1069_v51, inf  ;;  %v1119_v21 = vand.u32 2147483648, %v1069_v51 }
 0x25f   :  { %v1848_v32 = vpop.eup %1847  ;;  %v1085_v38 = vsel %vm1083_vm2, %v1084_v40, %v1082_v52  ;;  %vm1118_vm14 = vcmp.eq.f32.partialorder %v1069_v51, 0.0 }
 0x260   :  { %v1850_v3 = vpop.eup %1849  ;;  %1130 = vst.msk [vmem:[%s2295_s3 + $0x8] sm:$0xff] %vm1128_vm0, %v1085_v38  ;;  %v1073_v50 = vmul.f32 %v1848_v32, %v1057_v44  ;;  %v1071_v56 = vpop.xlane.xlu1 %1070 }
 0x261   :  { %v1094_v61 = vmul.f32 %v1850_v3, %v1063_v45  ;;  %1859 = vrsqrt.f32 %v1071_v56  ;;  %vm1123_vm15 = vcmp.eq.f32.partialorder %v1071_v56, inf  ;;  %v1126_v6 = vand.u32 2147483648, %v1071_v56 }
 0x262   :  { %v1075_v62 = vsel %vm1074_vm3, %v1057_v44, %v1073_v50  ;;  %vm1125_vm1 = vcmp.eq.f32.partialorder %v1071_v56, 0.0 }
 0x263   :  { %v1852_v12 = vpop.eup %1851  ;;  %v1078_v8 = vsel %vm1076_vm4, %v1077_v24, %v1075_v62  ;;  %v1096_v9 = vsel %vm1095_vm5, %v1063_v45, %v1094_v61 }
 0x264   :  { %v1854_v13 = vpop.eup %1853  ;;  %1129 = vst.msk [vmem:[%s2295_s3] sm:$0xff] %vm1128_vm0, %v1078_v8  ;;  %v1099_v16 = vsel %vm1097_vm6, %v1098_v58, %v1096_v9  ;;  %v1087_v18 = vmul.f32 %v1852_v12, %v1061_v1 }
 0x265   :  { %1132 = vst.msk [vmem:[%s2295_s3 + $0x18] sm:$0xff] %vm1128_vm0, %v1099_v16  ;;  %v1101_v30 = vmul.f32 %v1854_v13, %v1065_v49 }
 0x266   :  { %v1089_v41 = vsel %vm1088_vm7, %v1061_v1, %v1087_v18 }
 0x267   :  { %v1856_v47 = vpop.eup %1855  ;;  %v1092_v48 = vsel %vm1090_vm8, %v1091_v25, %v1089_v41  ;;  %v1103_v53 = vsel %vm1102_vm9, %v1065_v49, %v1101_v30 }
 0x268   :  { %v1858_v54 = vpop.eup %1857  ;;  %1131 = vst.msk [vmem:[%s2295_s3 + $0x10] sm:$0xff] %vm1128_vm0, %v1092_v48  ;;  %v1106_v55 = vsel %vm1104_vm10, %v1105_v46, %v1103_v53  ;;  %v1108_v5 = vmul.f32 %v1856_v47, %v1067_v39 }
 0x269   :  { %1133 = vst.msk [vmem:[%s2295_s3 + $0x20] sm:$0xff] %vm1128_vm0, %v1106_v55  ;;  %v1115_v17 = vmul.f32 %v1858_v54, %v1069_v51 }
 0x26a   :  { %v1110_v19 = vsel %vm1109_vm11, %v1067_v39, %v1108_v5 }
 0x26b   :  { %v1860_v22 = vpop.eup %1859  ;;  %v1113_v34 = vsel %vm1111_vm12, %v1112_v15, %v1110_v19  ;;  %v1117_v36 = vsel %vm1116_vm13, %v1069_v51, %v1115_v17 }
 0x26c   :  { %1134 = vst.msk [vmem:[%s2295_s3 + $0x28] sm:$0xff] %vm1128_vm0, %v1113_v34  ;;  %v1120_v20 = vsel %vm1118_vm14, %v1119_v21, %v1117_v36  ;;  %v1122_v63 = vmul.f32 %v1860_v22, %v1071_v56 }
 0x26d   :  { %1135 = vst.msk [vmem:[%s2295_s3 + $0x30] sm:$0xff] %vm1128_vm0, %v1120_v20 }
 0x26e   :  { %v1124_v7 = vsel %vm1123_vm15, %v1071_v56, %v1122_v63 }
 0x26f   :  { %v1127_v14 = vsel %vm1125_vm1, %v1126_v6, %v1124_v7 }
 0x270   :  { %1136 = vst.msk [vmem:[%s2295_s3 + $0x38] sm:$0xff] %vm1128_vm0, %v1127_v14 }
 0x271   :  { %1931 = dma.done.wait [#allocation4], 512  }
 0x272   :  { %1932 = vsyncadd [#allocation4], 4294966784 }
 0x273   :  { %1156 = vsyncpa [#allocation3], 1 }
 0x274   :  { %1157 = vsyncpa [#allocation6], 1 }
 0x275   :  { %1158 = vsyncpa [#allocation4], 1 }

</bundles_post_ra>
